<compile_context>
chip_gen: v7x
topology: tpu7x:2x2x1
jax: 0.10.0
libtpu: 0.0.40
codegen_flags: <defaults>
</compile_context>

<pallas_src>
import jax
import jax.numpy as jnp
from jax.experimental import pallas as pl
from jax.experimental.pallas import tpu as pltpu

LANES = 128            # vreg lane width
SUBLANES = 8           # vreg sublane count (f32)
MAX_BLOCK_ROWS = 4096  # 4096x128 f32 = 2 MiB/block; 2 arrays x 2 buffers = 8 MiB
SMALL_N_ELEMS = 65536  # below this, a fused XLA elementwise op beats kernel launch


def linear_kernel(w_ref, b_ref, x_ref, o_ref):
    # w_ref, b_ref: SMEM scalars; x_ref, o_ref: lane-dense VMEM tiles.
    o_ref[...] = x_ref[...] * w_ref[0] + b_ref[0]


def _pallas_scale_shift(slab, w_flat, b_flat):
    """slab: (rows, 128) lane-dense f32.  Returns slab * w + b via Pallas."""
    rows, lanes = slab.shape

    if rows <= 2 * SUBLANES:
        # Tiny forced case: one block equal to the full array (allowed even if
        # rows is not a multiple of 8, since it equals the full array dim).
        block_rows = rows
    else:
        # Aim for >= 2 grid steps (megacore on v7x + pipeline overlap), capped
        # at MAX_BLOCK_ROWS; block_rows must be a multiple of 8.  The grid uses
        # cdiv, so a partial edge block is masked by Pallas (no extra padding).
        target = min(MAX_BLOCK_ROWS, pl.cdiv(rows, 2))
        block_rows = ((target + SUBLANES - 1) // SUBLANES) * SUBLANES

    grid = (pl.cdiv(rows, block_rows),)

    return pl.pallas_call(
        linear_kernel,
        out_shape=jax.ShapeDtypeStruct((rows, lanes), slab.dtype),
        grid_spec=pltpu.PrefetchScalarGridSpec(
            num_scalar_prefetch=0,
            grid=grid,
            in_specs=[
                pl.BlockSpec(memory_space=pltpu.SMEM),                # weight (1,)
                pl.BlockSpec(memory_space=pltpu.SMEM),                # bias   (1,)
                pl.BlockSpec((block_rows, lanes), lambda i: (i, 0)),  # x slab
            ],
            out_specs=pl.BlockSpec((block_rows, lanes), lambda i: (i, 0)),
        ),
        compiler_params=pltpu.CompilerParams(
            # mem-bound op: lets both TensorCores on v7x split the row grid
            dimension_semantics=("parallel",),
        ),
    )(w_flat, b_flat, slab)


def neural_network_forward(x, weight, bias, *, min_pallas_elems=SMALL_N_ELEMS):
    """x: (N, 1) f32, weight: (1, 1) f32, bias: (1,) f32 -> (N, 1) f32."""
    n, f = x.shape
    assert f == 1, "nn.Linear(1, 1): single input feature expected"
    total = n * f

    # Small-N fast path: for tiny inputs (incl. the module's N=100) the whole
    # cost is dispatch overhead, so a fused XLA elementwise op is strictly
    # faster than pad + pallas_call + slice.
    if total < min_pallas_elems:
        return x * weight[0, 0] + bias[0]

    w_flat = weight.reshape(-1)  # (1,)
    b_flat = bias.reshape(-1)    # (1,)

    flat = x.reshape(-1)
    tail = total % LANES

    if tail == 0:
        # Lane-aligned: free reshape, zero extra HBM copies.
        slab = flat.reshape(total // LANES, LANES)
    else:
        # Misaligned: pad only the final lane row (and slice it off below).
        padded_total = total + (LANES - tail)
        slab = jnp.pad(flat, (0, padded_total - total)).reshape(
            padded_total // LANES, LANES)

    out_slab = _pallas_scale_shift(slab, w_flat, b_flat)

    out_flat = out_slab.reshape(-1)
    if tail != 0:
        out_flat = out_flat[:total]
    return out_flat.reshape(n, f)


if __name__ == "__main__":
    key = jax.random.PRNGKey(0)
    k_w, k_b = jax.random.split(key)

    # nn.Linear(1, 1) default init: U(-1/sqrt(fan_in), 1/sqrt(fan_in)) = U(-1, 1)
    weight = jax.random.uniform(k_w, (1, 1), jnp.float32, minval=-1.0, maxval=1.0)
    bias = jax.random.uniform(k_b, (1,), jnp.float32, minval=-1.0, maxval=1.0)

    def ref(v):
        return v @ weight.T + bias

    # 1) The module's actual input: torch.arange(100).unsqueeze(1) -> (100, 1).
    #    Takes the small-N fast path (pure XLA scale+shift).
    x_small = jnp.arange(100, dtype=jnp.float32).reshape(100, 1)
    out_small = jax.block_until_ready(neural_network_forward(x_small, weight, bias))
    assert out_small.shape == (100, 1)
    assert jnp.allclose(out_small, ref(x_small), rtol=1e-6, atol=1e-6)

    # 2) Pallas path, lane-aligned N (no pad / no slice), 2-step grid with a
    #    masked partial edge block.
    x_a = jnp.arange(3072, dtype=jnp.float32).reshape(3072, 1)
    out_a = jax.block_until_ready(
        neural_network_forward(x_a, weight, bias, min_pallas_elems=0))
    assert out_a.shape == (3072, 1)
    assert jnp.allclose(out_a, ref(x_a), rtol=1e-6, atol=1e-6)

    # 3) Pallas path, misaligned N (single-lane-row pad + slice), partial edge.
    x_b = jnp.arange(5000, dtype=jnp.float32).reshape(5000, 1)
    out_b = jax.block_until_ready(
        neural_network_forward(x_b, weight, bias, min_pallas_elems=0))
    assert out_b.shape == (5000, 1)
    assert jnp.allclose(out_b, ref(x_b), rtol=1e-6, atol=1e-6)

    print("KERNEL_OK")
</pallas_src>

<mosaic_0001>
module attributes {stable_mosaic.version = 11 : i64} {
  func.func @linear_kernel(%arg0: i32, %arg1: memref<1xf32, #tpu.memory_space<smem>>, %arg2: memref<1xf32, #tpu.memory_space<smem>>, %arg3: memref<16x128xf32, #tpu.memory_space<vmem>>, %arg4: memref<16x128xf32, #tpu.memory_space<vmem>>) attributes {dimension_semantics = [#tpu.dimension_semantics<parallel>], iteration_bounds = array<i64: 2>, scalar_prefetch = 0 : i64, scratch_operands = 0 : i64, tpu.core_type = #tpu.core_type<tc>, window_params = [{transform_indices = @transform_0, window_bounds = array<i64: 1>}, {transform_indices = @transform_1, window_bounds = array<i64: 1>}, {transform_indices = @transform_2, window_bounds = array<i64: 16, 128>}, {transform_indices = @transform_3, window_bounds = array<i64: 16, 128>}]} {
    %c0 = arith.constant 0 : index
    %c0_0 = arith.constant 0 : index
    %0 = vector.load %arg3[%c0, %c0_0] : memref<16x128xf32, #tpu.memory_space<vmem>>, vector<16x128xf32>
    %c0_1 = arith.constant 0 : index
    %1 = memref.load %arg1[%c0_1] : memref<1xf32, #tpu.memory_space<smem>>
    %2 = vector.broadcast %1 : f32 to vector<16x128xf32>
    %3 = arith.mulf %0, %2 : vector<16x128xf32>
    %c0_2 = arith.constant 0 : index
    %4 = memref.load %arg2[%c0_2] : memref<1xf32, #tpu.memory_space<smem>>
    %5 = vector.broadcast %4 : f32 to vector<16x128xf32>
    %6 = arith.addf %3, %5 : vector<16x128xf32>
    %c0_3 = arith.constant 0 : index
    %c0_4 = arith.constant 0 : index
    %7 = vector.load %arg4[%c0_3, %c0_4] : memref<16x128xf32, #tpu.memory_space<vmem>>, vector<16x128xf32>
    tpu.vector_store %arg4[%c0_3, %c0_4], %6 {strides = array<i32>} : memref<16x128xf32, #tpu.memory_space<vmem>>, vector<16x128xf32>,
    return
  }
  func.func @transform_0(%arg0: i32) -> i32 {
    %c0_i32 = arith.constant 0 : i32
    %c0_i32_0 = arith.constant 0 : i32
    return %c0_i32 : i32
  }
  func.func @transform_1(%arg0: i32) -> i32 {
    %c0_i32 = arith.constant 0 : i32
    %c0_i32_0 = arith.constant 0 : i32
    return %c0_i32 : i32
  }
  func.func @transform_2(%arg0: i32) -> (i32, i32) {
    %c0_i32 = arith.constant 0 : i32
    %c0_i32_0 = arith.constant 0 : i32
    return %arg0, %c0_i32 : i32, i32
  }
  func.func @transform_3(%arg0: i32) -> (i32, i32) {
    %c0_i32 = arith.constant 0 : i32
    %c0_i32_0 = arith.constant 0 : i32
    return %arg0, %c0_i32 : i32, i32
  }
}

</mosaic_0001>

<bundles_post_ra>
// kernel: tpu_custom_call.1
= control target key start
LH: loop header
LB: loop body
LE: loop exit
PB: predicated region body
PF: predicated region fallthrough
CT: control target
= control target key end

     0   :  { %s677_s0 = inlined_call_operand.<no memory space> [shape: f32[1], index: 0, kind: input, shape index: {}]   ;;  %s678_s1 = inlined_call_operand.<no memory space> [shape: f32[1], index: 1, kind: input, shape index: {}]   ;;  %s679_s2 = inlined_call_operand.hbm [shape: f32[24,128], index: 2, kind: input, shape index: {}]   ;;  %s680_s3 = inlined_call_operand.hbm [shape: f32[24,128], index: 3, kind: output, shape index: {}]  }
   0x1   :  { %8 = sst [smem:[#allocation2]] %s677_s0 }
   0x2   :  { %9 = sst [smem:[#allocation3]] %s678_s1 }
   0x3   :  { %10 = vsyncpa [#allocation5], 0 }
   0x4   :  { %12 = vsyncpa [#allocation5 + $0x1], 0 }
   0x5   :  { %13 = vsyncpa [#allocation6], 0 }
   0x6   :  { %15 = vsyncpa [#allocation6 + $0x1], 0  ;;  %s507_s16 = smov 0   ;;  %s509_s17 = smov 0  }
   0x7   :  { %s511_s18 = smov 0   ;;  %s513_s19 = smov 0  }
   0x8 LB: > { %s528_s0 = sadd.s32 4294967295, %s473_s19   ;;  %s312_s1 = sadd.s32 4294967294, %s473_s19   ;;  %s473_s19 = sphi %s513_s19, %s690_s19   ;;  %s469_s18 = sphi %s511_s18, %s689_s18   ;;  %s465_s17 = sphi %s509_s17, %s688_s17   ;;  %s461_s16 = sphi %s507_s16, %s687_s16  }
   0x9   : > { %s532_s20 = sadd.s32 1, %s473_s19   ;;  %s70_s21 = sadd.s32 1, %s469_s18 }
   0xa   : > { %s67_s22 = ssub.s32 %s473_s19, %s532_s20  ;;  %p77_p0 = scmp.ne.s32.totalorder %s469_s18, %s465_s17 }
   0xb   : > { %p68_p1 = scmp.eq.s32.totalorder %s67_s22, 0  ;;  %p78_p2 = scmp.eq.s32.totalorder %s473_s19, 0 }
   0xc   : > { %p83_p3 = scmp.ne.s32.totalorder %s465_s17, %s461_s16  ;;  %p84_p4 = scmp.eq.s32.totalorder %s528_s0, 0 }
   0xd   : > { %s544_s23 = scalar_select %p68_p1, %s469_s18, %s70_s21  }
   0xe   : > { %p79_p5 = por %p78_p2, %p77_p0  ;;  %p546_p6 = por %p84_p4, %p83_p3 }
   0xf   : > { %p107_p7 = scmp.eq.s32.totalorder %s528_s0, 1  ;;  %p113_p8 = scmp.eq.s32.totalorder %s312_s1, 1 }
  0x10   : > { %p681_p11 = scmp.ge.s32.totalorder %s473_s19, 2 }
  0x11   : > { %p551_p9 = por %p107_p7, %p77_p0  ;;  %p555_p10 = por %p113_p8, %p83_p3 }
  0x12   : > { %135 = sbr.rel (%p681_p11) target bundleno = 60 (0x3c), region = 24 }
  0x13   : > { %s684_s26 = scalar_select %p555_p10, 1, 0 }
  0x19   : > { %138 = sbr.rel (!%p79_p5) target bundleno = 60 (0x3c), region = 28  ;;  %s139_s27 = sand.u32 (%p79_p5), 1, %s469_s18  }
  0x1a   : > { %s316_s28 = sshll.u32 (%p79_p5), %s473_s19, 1  ;;  %s315_s29 = sshll.u32 (%p79_p5), %s139_s27, 4 }
  0x1b   : > { %s145_s30 = ssub.s32 (%p79_p5), 3, %s316_s28  ;;  %s567_s6 = scalar_lea.sflag (%p79_p5), [#allocation5], %s139_s27 }
  0x1c   : > { %p146_p12 = scmp.lt.s32.totalorder (%p79_p5), %s145_s30, 2  ;;  %s143_s7 = scalar_lea.vmem (%p79_p5), [#allocation4], %s315_s29 }
  0x20   : > { %s692_s30 = smov (!%p146_p12, %s145_s30), 2 }
  0x21   : > { %s564_s4 = sshll.u32 %s692_s30, 7 }
  0x22   : > { %s150_s5 = ssub.s32 256, %s564_s4 }
  0x23   : > { %151 = vsyncadd %s567_s6, %s150_s5  ;;  %p318_p13 = scmp.ne.s32.totalorder %s564_s4, 0  ;;  %s334_s8 = sshll.u32 %s473_s19, 8 }
  0x24   : > { %s575_s11 = scalar_lea.hbm %s679_s2, %s334_s8  ;;  %s156_s12 = sshll.u32 %s143_s7, 4  ;;  %s577_s12 = int_to_ptr.vmem [resolvable:$true] %s156_s12 }
  0x25   : > { %s379_s13 = scalar_lea.hbm %s575_s11, %s564_s4  ;;  %s383_s1 = scalar_lea.hbm %s679_s2, 384 }
  0x26   : > { %p380_p0 = scmp.ne.s32.totalorder %s575_s11, %s379_s13  ;;  %p384_p3 = scmp.lt.u32.totalorder %s575_s11, %s679_s2 }
  0x27   : > { %p385_p4 = scmp.lt.u32.totalorder %s383_s1, %s379_s13  ;;  %p387_p7 = scmp.lt.u32.totalorder %s379_s13, %s575_s11 }
  0x28   : > { %p381_p1 = pnand %p380_p0, %p318_p13 }
  0x29   : > { %p386_p5 = por %p385_p4, %p384_p3 }
  0x2a   : > { %p382_p2 = pneg %p381_p1 }
  0x2b   : > { %p388_p8 = por %p387_p7, %p386_p5 }
  0x2d   : > { %p389_p12 = pnand %p388_p8, %p382_p2 }
  0x2f   : > { %392 = shalt.err (!%p389_p12)
}
  0x30   : > { %s393_s27 = scalar_lea.vmem %s577_s12, %s564_s4  ;;  %s475_s28 = smov [#allocation4]  }
  0x31   : > { %p394_p0 = scmp.ne.s32.totalorder %s577_s12, %s393_s27  ;;  %s397_s29 = sshll.u32 %s475_s28, 4  ;;  %s398_s29 = int_to_ptr.vmem [resolvable:$false] %s397_s29 }
  0x32   : > { %s399_s30 = scalar_lea.vmem %s398_s29, 512  ;;  %p400_p10 = scmp.lt.s32.totalorder %s577_s12, %s398_s29 }
  0x33   : > { %p395_p1 = pnand %p394_p0, %p318_p13  ;;  %p401_p3 = scmp.lt.s32.totalorder %s399_s30, %s393_s27 }
  0x35   : > { %p396_p11 = pneg %p395_p1  ;;  %p402_p4 = por %p401_p3, %p400_p10 }
  0x37   : > { %p403_p5 = pnand %p402_p4, %p396_p11 }
  0x39   : > { %406 = shalt.err (!%p403_p5)
}
  0x3a   : > { %s476_s5 = smov 128   ;;  %s477_s7 = smov 8  }
  0x3b   : > { %162 = dma.hbm_to_vmem [thread:$0]  (%p318_p13), %s575_s11, %s564_s4, %s577_s12, %s567_s6, %s476_s5, %s476_s5, %s477_s7  }
  0x3c PF: > { %p322_p2 = scmp.ge.s32.totalorder %s473_s19, 1  ;;  %p164_p7 = scmp.lt.s32.totalorder %s473_s19, 3 }
  0x3e   : > { %p165_p8 = pnand %p322_p2, %p164_p7 }
  0x3f   : > { %s607_s8 = sand.u32 (!%p165_p8), 1, %s465_s17  }
  0x40   : > { %168 = sbr.rel (%p165_p8) target bundleno = 112 (0x70), region = 32  ;;  %s323_s9 = sshll.u32 (!%p165_p8), %s607_s8, 4 }
  0x41   : > { %s171_s10 = scalar_lea.sflag (!%p165_p8), [#allocation5], %s607_s8  ;;  %s174_s13 = scalar_lea.vmem (!%p165_p8), [#allocation4], %s323_s9 }
  0x47   : > { %452 = dma.done.wait (%p546_p6), %s171_s10, 256  }
  0x48   : > { %454 = vsyncadd (%p546_p6), %s171_s10, 4294967040  ;;  %s209_s4 = sld [smem:[#allocation2]]  ;;  %v207_v0 = vld [vmem:[%s174_s13] sm:$0xff]  ;;  %v208_v3 = vld [vmem:[%s174_s13 + $0x8] sm:$0xff]  ;;  %s196_s11 = scalar_lea.vmem [#allocation7], %s323_s9 }
  0x49   : > { %s213_s6 = sld [smem:[#allocation3]]  ;;  %s220_s12 = scalar_lea.sflag [#allocation6], %s607_s8 }
  0x4a   : > { %s326_s24 = sshll.u32 (%p551_p9), %s528_s0, 1 }
  0x4b   : > { %s228_s14 = ssub.s32 (%p551_p9), 3, %s326_s24 }
  0x4c   : > { %p229_p6 = scmp.lt.s32.totalorder (%p551_p9), %s228_s14, 2 }
  0x4d   : > { %226 = sbr.rel (!%p551_p9) target bundleno = 112 (0x70), region = 40 }
  0x4e   : > { %v210_v1 = vstv %s209_s4 }
  0x4f   : > { %v214_v2 = vstv %s213_s6  ;;  %v211_v4 = vmul.f32 %v210_v1, %v207_v0  ;;  %v212_v5 = vmul.f32 %v210_v1, %v208_v3 }
  0x51   : > { %v215_v6 = vadd.f32 %v214_v2, %v211_v4  ;;  %v216_v7 = vadd.f32 %v214_v2, %v212_v5 }
  0x53   : > { %217 = vst [vmem:[%s196_s11] sm:$0xff] %v215_v6  ;;  %218 = vst [vmem:[%s196_s11 + $0x8] sm:$0xff] %v216_v7 }
  0x54   : > { %s694_s14 = smov (!%p229_p6, %s228_s14), 2 }
  0x55   : > { %s619_s15 = sshll.u32 %s694_s14, 7 }
  0x56   : > { %s233_s1 = ssub.s32 256, %s619_s15 }
  0x57   : > { %234 = vsyncadd %s220_s12, %s233_s1  ;;  %p328_p10 = scmp.ne.s32.totalorder %s619_s15, 0  ;;  %s335_s21 = sshll.u32 %s528_s0, 8 }
  0x58   : > { %s629_s27 = scalar_lea.hbm %s680_s3, %s335_s21  ;;  %s239_s28 = sshll.u32 %s196_s11, 4  ;;  %s631_s28 = int_to_ptr.vmem [resolvable:$true] %s239_s28 }
  0x59   : > { %s407_s29 = scalar_lea.vmem %s631_s28, %s619_s15  ;;  %s478_s30 = smov [#allocation7]  }
  0x5a   : > { %p408_p9 = scmp.ne.s32.totalorder %s631_s28, %s407_s29  ;;  %s411_s5 = sshll.u32 %s478_s30, 4  ;;  %s412_s5 = int_to_ptr.vmem [resolvable:$false] %s411_s5 }
  0x5b   : > { %s413_s0 = scalar_lea.vmem %s412_s5, 512  ;;  %p414_p12 = scmp.lt.s32.totalorder %s631_s28, %s412_s5 }
  0x5c   : > { %p409_p11 = pnand %p408_p9, %p328_p10  ;;  %p415_p0 = scmp.lt.s32.totalorder %s413_s0, %s407_s29 }
  0x5e   : > { %p410_p13 = pneg %p409_p11  ;;  %p416_p1 = por %p415_p0, %p414_p12 }
  0x60   : > { %p417_p3 = pnand %p416_p1, %p410_p13 }
  0x62   : > { %420 = shalt.err (!%p417_p3)
}
  0x63   : > { %s421_s7 = scalar_lea.hbm %s629_s27, %s619_s15  ;;  %s425_s13 = scalar_lea.hbm %s680_s3, 384 }
  0x64   : > { %p422_p4 = scmp.ne.s32.totalorder %s629_s27, %s421_s7  ;;  %p426_p7 = scmp.lt.u32.totalorder %s629_s27, %s680_s3 }
  0x65   : > { %p427_p8 = scmp.lt.u32.totalorder %s425_s13, %s421_s7  ;;  %p429_p9 = scmp.lt.u32.totalorder %s421_s7, %s629_s27 }
  0x66   : > { %p423_p5 = pnand %p422_p4, %p328_p10 }
  0x67   : > { %p428_p6 = por %p427_p8, %p426_p7 }
  0x68   : > { %p424_p2 = pneg %p423_p5 }
  0x69   : > { %p430_p11 = por %p429_p9, %p428_p6 }
  0x6b   : > { %p431_p13 = pnand %p430_p11, %p424_p2 }
  0x6d   : > { %434 = shalt.err (!%p431_p13)
}
  0x6e   : > { %s479_s11 = smov 128   ;;  %s480_s24 = smov 8  }
  0x6f   : > { %245 = dma.vmem_to_hbm [thread:$0]  (%p328_p10), %s631_s28, %s619_s15, %s629_s27, %s220_s12, %s479_s11, %s479_s11, %s480_s24  }
  0x70 PF: > { %s254_s14 = sand.u32 1, %s461_s16   ;;  %p685_p12 = scmp.ne.s32.totalorder %s684_s26, 0 }
  0x71   : > { %p686_p0 = scmp.ge.s32.totalorder %s473_s19, 2  ;;  %s255_s1 = scalar_lea.sflag [#allocation6], %s254_s14 }
  0x73   : > { %p339_p1 = pnand %p686_p0, %p685_p12 }
  0x75   : > { %456 = dma.done.wait (!%p339_p1), %s255_s1, 256  }
  0x76   : > { %458 = vsyncadd (!%p339_p1), %s255_s1, 4294967040  ;;  %p18_p3 = scmp.ge.s32.totalorder %s532_s20, 4   ;;  %s687_s16 = smov %s465_s17 }
  0x77   : > { %s688_s17 = smov %s469_s18  ;;  %s689_s18 = smov %s544_s23 }
  0x78   : > { %s690_s19 = smov %s532_s20  ;;  %20 = sbr.rel (!%p18_p3) target bundleno = 8 (0x8), region = 77 }
  0x7f   :  { %260 = vsyncpa [#allocation5], 1 }
  0x80   :  { %262 = vsyncpa [#allocation5 + $0x1], 1 }
  0x81   :  { %263 = vsyncpa [#allocation6], 1 }
  0x82   :  { %265 = vsyncpa [#allocation6 + $0x1], 1 }

</bundles_post_ra>
